<compile_context>
chip_gen: v6e
topology: v6e:2x2x1
jax: 0.10.0
libtpu: 0.0.40
codegen_flags: <defaults>
</compile_context>

<pallas_src>
import math

import jax
import jax.numpy as jnp
from jax import lax
from jax.experimental import pallas as pl
from jax.experimental.pallas import tpu as pltpu


def _round_up(x, m):
    return (x + m - 1) // m * m


def _vmem_specs(n):
    return [pl.BlockSpec(memory_space=pltpu.MemorySpace.VMEM) for _ in range(n)]


# ----------------------------------------------------------------------------
# Pallas kernels
# ----------------------------------------------------------------------------

def gru_encoder_kernel(x_ref, len_ref, wih_ref, whh_ref, bih_ref, bhh_ref,
                       h_ref, gi_ref):
    """nn.GRU (1 layer, unidirectional) with pack_padded length-freeze.

    x_ref   : (S*Bp, Ep)   bf16  time-major flattened embedded source
    len_ref : (Bp, 1)      f32   lengths (0 for padded batch rows)
    wih_ref : (Ep, 3*Hp)   bf16  gate chunks [r|z|n], each Hp wide (lane aligned)
    whh_ref : (Hp, 3*Hp)   bf16
    bih_ref, bhh_ref : (1, 3*Hp) f32
    h_ref   : (Bp, Hp)     f32   hidden at each sequence's last valid step
    gi_ref  : (S*Bp, 3*Hp) f32   VMEM scratch (hoisted input projection)
    """
    Bp, Hp = h_ref.shape
    S = x_ref.shape[0] // Bp

    # Hoisted input projection: one MXU-friendly matmul for all timesteps.
    gi_ref[...] = (jnp.dot(x_ref[...], wih_ref[...],
                           preferred_element_type=jnp.float32) + bih_ref[...])

    # Loop-invariant operands loaded once (closure), not re-read per step.
    whh = whh_ref[...]
    bhh = bhh_ref[...]
    lens = len_ref[...]

    def step(t, h):
        row = pl.multiple_of(t * Bp, Bp)
        gi = gi_ref[pl.ds(row, Bp), :]                                # (Bp, 3Hp)
        gh = (jnp.dot(h.astype(jnp.bfloat16), whh,
                      preferred_element_type=jnp.float32) + bhh)
        r = jax.nn.sigmoid(gi[:, 0:Hp] + gh[:, 0:Hp])
        z = jax.nn.sigmoid(gi[:, Hp:2 * Hp] + gh[:, Hp:2 * Hp])
        n = jnp.tanh(gi[:, 2 * Hp:3 * Hp] + r * gh[:, 2 * Hp:3 * Hp])
        h_new = (1.0 - z) * n + z * h
        # pack_padded_sequence semantics: freeze h once t >= length.
        mask = t.astype(jnp.float32) < lens                            # (Bp, 1)
        return jnp.where(mask, h_new, h)

    h_ref[...] = lax.fori_loop(0, S, step, jnp.zeros((Bp, Hp), jnp.float32))


def cond_gru_kernel(x_ref, h0_ref, ctx_ref, wi_ref, wh_ref, wp_ref,
                    bi_ref, bh_ref, bp_ref, out_ref, gi_ref, hs_ref):
    """ConditionalGRU (GRU with peepholes on a constant ctx).

    x_ref  : (T*Bp, Ep)   bf16   time-major flattened embedded target
    h0_ref : (Bp, Hp)     f32    initial hidden (= encoder h_t)
    ctx_ref: (Bp, Hp)     f32    context        (= encoder h_t)
    w*_ref : (., 3*Hp)    bf16   gate chunks [r|i|n]
    b*_ref : (1, 3*Hp)    f32
    out_ref: (Bp, T, Hp)  f32    all decoder hidden states, batch-major
    gi_ref : (T*Bp, 3*Hp) f32    scratch: hoisted input projection
    hs_ref : (T, Bp, Hp)  f32    scratch: per-step hidden (full-tile stores)
    """
    Bp, T, Hp = out_ref.shape

    gi_ref[...] = (jnp.dot(x_ref[...], wi_ref[...],
                           preferred_element_type=jnp.float32) + bi_ref[...])
    wh = wh_ref[...]
    bh = bh_ref[...]
    # ctx is constant across timesteps -> peephole projection hoisted
    # (identical math to recomputing it every step as in the torch loop).
    peep = (jnp.dot(ctx_ref[...].astype(jnp.bfloat16), wp_ref[...],
                    preferred_element_type=jnp.float32) + bp_ref[...])

    def step(t, h):
        row = pl.multiple_of(t * Bp, Bp)
        gi = gi_ref[pl.ds(row, Bp), :]
        gh = (jnp.dot(h.astype(jnp.bfloat16), wh,
                      preferred_element_type=jnp.float32) + bh)
        resetgate = jax.nn.sigmoid(gi[:, 0:Hp] + gh[:, 0:Hp] + peep[:, 0:Hp])
        inputgate = jax.nn.sigmoid(gi[:, Hp:2 * Hp] + gh[:, Hp:2 * Hp]
                                   + peep[:, Hp:2 * Hp])
        newgate = jnp.tanh(gi[:, 2 * Hp:3 * Hp]
                           + resetgate * gh[:, 2 * Hp:3 * Hp]
                           + peep[:, 2 * Hp:3 * Hp])
        hy = newgate + inputgate * (h - newgate)
        hs_ref[t] = hy                       # (Bp,Hp)=(8,128) lane-dense store
        return hy

    lax.fori_loop(0, T, step, h0_ref[...])

    # One-time reorder (T, Bp, Hp) -> (Bp, T, Hp) with static slices, so the
    # vocab projection needs no transpose / reshape HBM round-trip downstream.
    for b in range(Bp):
        out_ref[b] = hs_ref[:, b, :]


def dec2vocab_kernel(h_ref, w_ref, b_ref, o_ref):
    """One (time-tile, vocab-tile) block of decoder2vocab.

    h_ref: (Bp, tt, Hp) f32, w_ref: (Hp, tn) bf16, b_ref: (1, tn) f32,
    o_ref: (Bp, tt, tn) f32.
    """
    Bp, tt, Hp = h_ref.shape
    x = h_ref[...].reshape(Bp * tt, Hp).astype(jnp.bfloat16)   # free reshape
    y = (jnp.dot(x, w_ref[...], preferred_element_type=jnp.float32)
         + b_ref[...])
    o_ref[...] = y.reshape(Bp, tt, -1)


def nli_head_kernel(s1_ref, s2_ref, w1_ref, b1_ref, w2_ref, b2_ref, o_ref):
    """[s1, s2, |s1-s2|, s1*s2] -> Linear(4H,512) -> ReLU -> Linear(512,3).

    The lane-axis concat is replaced by four summed partial matmuls against
    Hp-row blocks of w1 (stays on the MXU accumulate path, no XLU copy).
    """
    Hp = s1_ref.shape[1]
    s1 = s1_ref[...]
    s2 = s2_ref[...]
    feats = (s1, s2, jnp.abs(s1 - s2), s1 * s2)
    h = b1_ref[...]
    for k, f in enumerate(feats):
        h = h + jnp.dot(f.astype(jnp.bfloat16),
                        w1_ref[k * Hp:(k + 1) * Hp, :],
                        preferred_element_type=jnp.float32)
    h = jnp.maximum(h, 0.0)
    o_ref[...] = (jnp.dot(h.astype(jnp.bfloat16), w2_ref[...],
                          preferred_element_type=jnp.float32) + b2_ref[...])


# ----------------------------------------------------------------------------
# Wrappers (embedding lookup, padding, pallas_call plumbing)
# ----------------------------------------------------------------------------

def encoder_last_hidden(kp, tokens, lengths):
    """nn.GRU(batch_first=True) over packed sequence -> final hidden (Bp, Hp)."""
    B, S = tokens.shape
    Bp = _round_up(B, 8)
    Hp = kp["Hp"]
    # Embed in time-major order by transposing the tiny int32 token matrix
    # (no HBM transpose of the embedded activations).
    x = jnp.take(kp["src_embedding"], jnp.transpose(tokens), axis=0)  # (S,B,Ep)
    if Bp != B:
        x = jnp.pad(x, ((0, 0), (0, Bp - B), (0, 0)))
    x2 = x.reshape(S * Bp, x.shape[-1])
    lens = jnp.zeros((Bp, 1), jnp.float32).at[:B, 0].set(
        lengths.astype(jnp.float32))
    return pl.pallas_call(
        gru_encoder_kernel,
        out_shape=jax.ShapeDtypeStruct((Bp, Hp), jnp.float32),
        in_specs=_vmem_specs(6),
        out_specs=pl.BlockSpec(memory_space=pltpu.MemorySpace.VMEM),
        scratch_shapes=[pltpu.VMEM((S * Bp, 3 * Hp), jnp.float32)],
    )(x2, lens, kp["enc_wih"], kp["enc_whh"], kp["enc_bih"], kp["enc_bhh"])


def conditional_gru(kp, task_idx, trg_tokens, h0_pad, ctx_pad):
    """ConditionalGRU.forward -> (Bp, T, Hp) batch-major hidden states."""
    B, T = trg_tokens.shape
    Bp, Hp = h0_pad.shape
    d = kp["decoders"][task_idx]
    x = jnp.take(kp["trg_embedding"][task_idx], jnp.transpose(trg_tokens),
                 axis=0)                                              # (T,B,Ep)
    if Bp != B:
        x = jnp.pad(x, ((0, 0), (0, Bp - B), (0, 0)))
    x2 = x.reshape(T * Bp, x.shape[-1])
    return pl.pallas_call(
        cond_gru_kernel,
        out_shape=jax.ShapeDtypeStruct((Bp, T, Hp), jnp.float32),
        in_specs=_vmem_specs(9),
        out_specs=pl.BlockSpec(memory_space=pltpu.MemorySpace.VMEM),
        scratch_shapes=[pltpu.VMEM((T * Bp, 3 * Hp), jnp.float32),
                        pltpu.VMEM((T, Bp, Hp), jnp.float32)],
    )(x2, h0_pad, ctx_pad,
      d["wi"], d["wh"], d["wp"], d["bi"], d["bh"], d["bp"])


def decoder2vocab(kp, task_idx, trg_h):
    """Gridded (time-tiles x vocab-tiles) linear; output (Bp, T, Vp)."""
    Bp, T, Hp = trg_h.shape
    w = kp["decoder2vocab_w"][task_idx]      # (Hp, Vp) bf16
    b = kp["decoder2vocab_b"][task_idx]      # (1, Vp)  f32
    Vp = w.shape[1]
    tt = min(T, 64) if T % 8 == 0 else T
    tn = 512 if Vp % 512 == 0 else (256 if Vp % 256 == 0 else 128)
    return pl.pallas_call(
        dec2vocab_kernel,
        out_shape=jax.ShapeDtypeStruct((Bp, T, Vp), jnp.float32),
        grid=(pl.cdiv(T, tt), Vp // tn),
        in_specs=[pl.BlockSpec((Bp, tt, Hp), lambda i, j: (0, i, 0)),
                  pl.BlockSpec((Hp, tn), lambda i, j: (0, j)),
                  pl.BlockSpec((1, tn), lambda i, j: (0, j))],
        out_specs=pl.BlockSpec((Bp, tt, tn), lambda i, j: (0, i, j)),
        compiler_params=pltpu.CompilerParams(
            dimension_semantics=("parallel", "parallel"),
            vmem_limit_bytes=48 * 1024 * 1024),
    )(trg_h, w, b)


def nli_head(kp, s1_h, s2_h):
    B, Hp = s1_h.shape
    Bp = _round_up(B, 8)
    if Bp != B:
        s1_h = jnp.pad(s1_h, ((0, Bp - B), (0, 0)))
        s2_h = jnp.pad(s2_h, ((0, Bp - B), (0, 0)))
    Cp = kp["nli_w2"].shape[1]
    out = pl.pallas_call(
        nli_head_kernel,
        out_shape=jax.ShapeDtypeStruct((Bp, Cp), jnp.float32),
        in_specs=_vmem_specs(6),
        out_specs=pl.BlockSpec(memory_space=pltpu.MemorySpace.VMEM),
    )(s1_h, s2_h, kp["nli_w1"], kp["nli_b1"], kp["nli_w2"], kp["nli_b2"])
    return out[:B, :3]


def multitask_forward_seq2seq(kp, input_src, input_trg, src_lens, task_idx):
    """MultitaskModel.forward, minibatch['type'] != 'nli' (unpaired)."""
    B, _ = input_trg.shape
    h_t = encoder_last_hidden(kp, input_src, src_lens)            # (Bp, Hp)
    # enc_drp (p=0.0) -> identity.
    trg_h = conditional_gru(kp, task_idx, input_trg, h_t, h_t)    # (Bp, T, Hp)
    logits = decoder2vocab(kp, task_idx, trg_h)                   # (Bp, T, Vp)
    return logits[:B, :, :kp["trg_vocab"]]                        # (B, T, V)


def multitask_forward_nli(kp, sent1, sent2, sent1_lens, sent2_lens,
                          rev_sent1, rev_sent2):
    """MultitaskModel.forward, minibatch['type'] == 'nli'."""
    B, S1 = sent1.shape
    _, S2 = sent2.shape
    S = max(S1, S2)
    if S1 < S:
        sent1 = jnp.pad(sent1, ((0, 0), (0, S - S1)),
                        constant_values=kp["pad_src"])
    if S2 < S:
        sent2 = jnp.pad(sent2, ((0, 0), (0, S - S2)),
                        constant_values=kp["pad_src"])
    # Single encoder launch over the stacked 2B batch (better sublane fill).
    tokens = jnp.concatenate([sent1, sent2], axis=0)
    lens = jnp.concatenate([sent1_lens, sent2_lens], axis=0)
    h = encoder_last_hidden(kp, tokens, lens)                     # (>=2B, Hp)
    sent1_h = jnp.take(h[:B], rev_sent1, axis=0)   # index_select(0, rev_sent1)
    sent2_h = jnp.take(h[B:2 * B], rev_sent2, axis=0)
    return nli_head(kp, sent1_h, sent2_h)                         # (B, 3)


# ----------------------------------------------------------------------------
# Parameters: torch-layout construction + packing into kernel layout
# ----------------------------------------------------------------------------

def make_params(key, src_vocab, trg_vocab, src_emb_dim, trg_emb_dim,
                hidden_dim, num_tasks, pad_src, pad_trg):
    """Torch-layout f32 parameters (mirrors MultitaskModel.__init__)."""
    ks = list(jax.random.split(key, 16 + 8 * num_tasks))
    ki = iter(ks)

    def uni(shape, scale):
        return jax.random.uniform(next(ki), shape, jnp.float32, -scale, scale)

    stdv_h = 1.0 / math.sqrt(hidden_dim)

    src_embedding = uni((src_vocab, src_emb_dim), 0.1)
    src_embedding = src_embedding.at[pad_src].set(0.0)   # nn.Embedding padding_idx

    params = {
        "src_embedding": src_embedding,
        # nn.GRU(src_emb_dim, hidden_dim, 1) params, gate order [r|z|n]
        "enc_wih": uni((3 * hidden_dim, src_emb_dim), stdv_h),
        "enc_whh": uni((3 * hidden_dim, hidden_dim), stdv_h),
        "enc_bih": uni((3 * hidden_dim,), stdv_h),
        "enc_bhh": uni((3 * hidden_dim,), stdv_h),
        "trg_embedding": [],
        "decoders": [],
        "decoder2vocab_w": [],
        "decoder2vocab_b": [],
        # nli_decoder: Linear(4H, 512) -> ReLU -> Linear(512, 3)
        "nli_w1": uni((512, 4 * hidden_dim), 1.0 / math.sqrt(4 * hidden_dim)),
        "nli_b1": uni((512,), 1.0 / math.sqrt(4 * hidden_dim)),
        "nli_w2": uni((3, 512), 1.0 / math.sqrt(512)),
        "nli_b2": uni((3,), 1.0 / math.sqrt(512)),
    }
    for _ in range(num_tasks):
        emb = uni((trg_vocab, trg_emb_dim), 0.1).at[pad_trg].set(0.0)
        params["trg_embedding"].append(emb)
        params["decoders"].append({
            "wi": uni((3 * hidden_dim, trg_emb_dim), stdv_h),
            "wh": uni((3 * hidden_dim, hidden_dim), stdv_h),
            "wp": uni((3 * hidden_dim, hidden_dim), stdv_h),
            "bi": uni((3 * hidden_dim,), stdv_h),
            "bh": uni((3 * hidden_dim,), stdv_h),
            "bp": uni((3 * hidden_dim,), stdv_h),
        })
        params["decoder2vocab_w"].append(uni((trg_vocab, hidden_dim),
                                             1.0 / math.sqrt(hidden_dim)))
        params["decoder2vocab_b"].append(jnp.zeros((trg_vocab,), jnp.float32))
    return params


def pack_params(p, pad_src, pad_trg):
    """Convert torch-layout params to lane-aligned, transposed, bf16 layout.

    Gate chunks are placed at [g*Hp, g*Hp+H) of a 3*Hp-wide matrix with zero
    padding, so padded hidden columns stay exactly zero through the recurrence.
    """
    H = p["enc_whh"].shape[1]
    Hp = _round_up(H, 128)

    def pad_emb(t):
        V, E = t.shape
        return jnp.pad(t, ((0, 0), (0, _round_up(E, 128) - E))).astype(jnp.bfloat16)

    def gates_w(w, in_pad):          # w: (3H, in_dim) -> (in_pad, 3*Hp) bf16
        in_dim = w.shape[1]
        out = jnp.zeros((in_pad, 3 * Hp), jnp.float32)
        for g in range(3):
            out = out.at[:in_dim, g * Hp:g * Hp + H].set(
                w[g * H:(g + 1) * H, :].T)
        return out.astype(jnp.bfloat16)

    def gates_b(b):                  # (3H,) -> (1, 3*Hp) f32
        out = jnp.zeros((1, 3 * Hp), jnp.float32)
        for g in range(3):
            out = out.at[0, g * Hp:g * Hp + H].set(b[g * H:(g + 1) * H])
        return out

    Ep_src = _round_up(p["src_embedding"].shape[1], 128)
    kp = {
        "H": H, "Hp": Hp, "pad_src": pad_src, "pad_trg": pad_trg,
        "src_embedding": pad_emb(p["src_embedding"]),
        "enc_wih": gates_w(p["enc_wih"], Ep_src),
        "enc_whh": gates_w(p["enc_whh"], Hp),
        "enc_bih": gates_b(p["enc_bih"]),
        "enc_bhh": gates_b(p["enc_bhh"]),
        "trg_embedding": [], "decoders": [],
        "decoder2vocab_w": [], "decoder2vocab_b": [],
        "trg_vocab": p["decoder2vocab_w"][0].shape[0],
    }
    for t in range(len(p["decoders"])):
        emb = p["trg_embedding"][t]
        Ep_t = _round_up(emb.shape[1], 128)
        kp["trg_embedding"].append(pad_emb(emb))
        d = p["decoders"][t]
        kp["decoders"].append({
            "wi": gates_w(d["wi"], Ep_t),
            "wh": gates_w(d["wh"], Hp),
            "wp": gates_w(d["wp"], Hp),
            "bi": gates_b(d["bi"]),
            "bh": gates_b(d["bh"]),
            "bp": gates_b(d["bp"]),
        })
        wv, bv = p["decoder2vocab_w"][t], p["decoder2vocab_b"][t]
        V = wv.shape[0]
        Vp = _round_up(V, 128)
        kp["decoder2vocab_w"].append(
            jnp.zeros((Hp, Vp), jnp.float32).at[:H, :V].set(wv.T).astype(jnp.bfloat16))
        kp["decoder2vocab_b"].append(
            jnp.zeros((1, Vp), jnp.float32).at[0, :V].set(bv))
    # NLI head: Linear(4H,512) as 4 Hp-row blocks; Linear(512,3) lane-padded.
    w1 = p["nli_w1"]
    w1k = jnp.zeros((4 * Hp, 512), jnp.float32)
    for k in range(4):
        w1k = w1k.at[k * Hp:k * Hp + H, :].set(w1[:, k * H:(k + 1) * H].T)
    kp["nli_w1"] = w1k.astype(jnp.bfloat16)
    kp["nli_b1"] = p["nli_b1"].reshape(1, -1)
    Cp = 128
    kp["nli_w2"] = (jnp.zeros((512, Cp), jnp.float32)
                    .at[:, :3].set(p["nli_w2"].T).astype(jnp.bfloat16))
    kp["nli_b2"] = jnp.zeros((1, Cp), jnp.float32).at[0, :3].set(p["nli_b2"])
    return kp


# ----------------------------------------------------------------------------
# Main
# ----------------------------------------------------------------------------

if __name__ == "__main__":
    key = jax.random.PRNGKey(0)

    B = 2
    S_SRC, S_TRG = 8, 8
    SRC_EMB, TRG_EMB = 16, 16
    HIDDEN = 32                      # src_hidden_dim == trg_hidden_dim
    SRC_VOCAB, TRG_VOCAB = 300, 512
    NUM_TASKS = 2
    PAD_SRC, PAD_TRG = 0, 0

    kp_key, k1, k2, k3, k4 = jax.random.split(key, 5)
    torch_params = make_params(kp_key, SRC_VOCAB, TRG_VOCAB, SRC_EMB, TRG_EMB,
                               HIDDEN, NUM_TASKS, PAD_SRC, PAD_TRG)
    kparams = pack_params(torch_params, PAD_SRC, PAD_TRG)

    # seq2seq minibatch (lengths sorted descending, as pack_padded_sequence requires)
    input_src = jax.random.randint(k1, (B, S_SRC), 1, SRC_VOCAB, dtype=jnp.int32)
    input_trg = jax.random.randint(k2, (B, S_TRG), 1, TRG_VOCAB, dtype=jnp.int32)
    src_lens = jnp.array([8, 5], dtype=jnp.int32)

    logits = multitask_forward_seq2seq(kparams, input_src, input_trg, src_lens,
                                       task_idx=0)
    logits = jax.block_until_ready(logits)
    assert logits.shape == (B, S_TRG, TRG_VOCAB), logits.shape

    # NLI minibatch
    sent1 = jax.random.randint(k3, (B, S_SRC), 1, SRC_VOCAB, dtype=jnp.int32)
    sent2 = jax.random.randint(k4, (B, S_TRG), 1, SRC_VOCAB, dtype=jnp.int32)
    sent1_lens = jnp.array([7, 4], dtype=jnp.int32)
    sent2_lens = jnp.array([8, 6], dtype=jnp.int32)
    rev_sent1 = jnp.array([0, 1], dtype=jnp.int32)
    rev_sent2 = jnp.array([0, 1], dtype=jnp.int32)

    class_logits = multitask_forward_nli(kparams, sent1, sent2, sent1_lens,
                                         sent2_lens, rev_sent1, rev_sent2)
    class_logits = jax.block_until_ready(class_logits)
    assert class_logits.shape == (B, 3), class_logits.shape

    print("KERNEL_OK")
</pallas_src>

<mosaic_0001>
module attributes {stable_mosaic.version = 11 : i64} {
  func.func @gru_encoder_kernel(%arg0: memref<64x128xbf16, #tpu.memory_space<vmem>>, %arg1: memref<8x1xf32, #tpu.memory_space<vmem>>, %arg2: memref<128x384xbf16, #tpu.memory_space<vmem>>, %arg3: memref<128x384xbf16, #tpu.memory_space<vmem>>, %arg4: memref<1x384xf32, #tpu.memory_space<vmem>>, %arg5: memref<1x384xf32, #tpu.memory_space<vmem>>, %arg6: memref<8x128xf32, #tpu.memory_space<vmem>>, %arg7: memref<64x384xf32, #tpu.memory_space<vmem>>) attributes {dimension_semantics = [], scalar_prefetch = 0 : i64, scratch_operands = 1 : i64, tpu.core_type = #tpu.core_type<tc>} {
    %c0 = arith.constant 0 : index
    %c0_0 = arith.constant 0 : index
    %0 = vector.load %arg0[%c0, %c0_0] : memref<64x128xbf16, #tpu.memory_space<vmem>>, vector<64x128xbf16>
    %c0_1 = arith.constant 0 : index
    %c0_2 = arith.constant 0 : index
    %1 = vector.load %arg2[%c0_1, %c0_2] : memref<128x384xbf16, #tpu.memory_space<vmem>>, vector<128x384xbf16>
    %cst = arith.constant dense<0.000000e+00> : vector<64x384xf32>
    %2 = tpu.matmul %0, %1, %cst {dimension_numbers = #tpu.dot_dimension_numbers<[1], [0], [0], [1], [0, 0, 1, 1], [], []>} : vector<64x128xbf16>, vector<128x384xbf16>, vector<64x384xf32> -> vector<64x384xf32>
    %c0_3 = arith.constant 0 : index
    %c0_4 = arith.constant 0 : index
    %3 = vector.load %arg4[%c0_3, %c0_4] : memref<1x384xf32, #tpu.memory_space<vmem>>, vector<1x384xf32>
    %4 = vector.broadcast %3 : vector<1x384xf32> to vector<64x384xf32>
    %5 = arith.addf %2, %4 : vector<64x384xf32>
    %c0_5 = arith.constant 0 : index
    %c0_6 = arith.constant 0 : index
    %6 = vector.load %arg7[%c0_5, %c0_6] : memref<64x384xf32, #tpu.memory_space<vmem>>, vector<64x384xf32>
    tpu.vector_store %arg7[%c0_5, %c0_6], %5 {strides = array<i32>} : memref<64x384xf32, #tpu.memory_space<vmem>>, vector<64x384xf32>,
    %c0_7 = arith.constant 0 : index
    %c0_8 = arith.constant 0 : index
    %7 = vector.load %arg3[%c0_7, %c0_8] : memref<128x384xbf16, #tpu.memory_space<vmem>>, vector<128x384xbf16>
    %c0_9 = arith.constant 0 : index
    %c0_10 = arith.constant 0 : index
    %8 = vector.load %arg5[%c0_9, %c0_10] : memref<1x384xf32, #tpu.memory_space<vmem>>, vector<1x384xf32>
    %c0_11 = arith.constant 0 : index
    %c0_12 = arith.constant 0 : index
    %9 = vector.load %arg1[%c0_11, %c0_12] : memref<8x1xf32, #tpu.memory_space<vmem>>, vector<8x1xf32>
    %cst_13 = arith.constant 0.000000e+00 : f32
    %10 = vector.broadcast %cst_13 : f32 to vector<8x128xf32>
    %c0_i32 = arith.constant 0 : i32
    %c8_i32 = arith.constant 8 : i32
    %11 = arith.addi %c0_i32, %c8_i32 : i32
    %c1_i32 = arith.constant 1 : i32
    %12 = scf.for %arg8 = %c0_i32 to %11 step %c1_i32 iter_args(%arg9 = %10) -> (vector<8x128xf32>)  : i32 {
      %c8_i32_17 = arith.constant 8 : i32
      %14 = arith.muli %arg8, %c8_i32_17 : i32
      %15 = tpu.assume_multiple %14, 8 : i32
      %16 = arith.index_cast %15 : i32 to index
      %c0_18 = arith.constant 0 : index
      %17 = vector.load %arg7[%16, %c0_18] : memref<64x384xf32, #tpu.memory_space<vmem>>, vector<8x384xf32>
      %18 = arith.truncf %arg9 : vector<8x128xf32> to vector<8x128xbf16>
      %cst_19 = arith.constant dense<0.000000e+00> : vector<8x384xf32>
      %19 = tpu.matmul %18, %7, %cst_19 {dimension_numbers = #tpu.dot_dimension_numbers<[1], [0], [0], [1], [0, 0, 1, 1], [], []>} : vector<8x128xbf16>, vector<128x384xbf16>, vector<8x384xf32> -> vector<8x384xf32>
      %20 = vector.broadcast %8 : vector<1x384xf32> to vector<8x384xf32>
      %21 = arith.addf %19, %20 : vector<8x384xf32>
      %22 = vector.extract_strided_slice %17 {offsets = [0, 0], sizes = [8, 128], strides = [1, 1]} : vector<8x384xf32> to vector<8x128xf32>
      %23 = vector.extract_strided_slice %21 {offsets = [0, 0], sizes = [8, 128], strides = [1, 1]} : vector<8x384xf32> to vector<8x128xf32>
      %24 = arith.addf %22, %23 : vector<8x128xf32>
      %25 = arith.negf %24 : vector<8x128xf32>
      %26 = math.exp %25 : vector<8x128xf32>
      %cst_20 = arith.constant 1.000000e+00 : f32
      %27 = vector.broadcast %cst_20 : f32 to vector<8x128xf32>
      %28 = arith.addf %27, %26 : vector<8x128xf32>
      %29 = arith.divf %27, %28 : vector<8x128xf32>
      %30 = vector.extract_strided_slice %17 {offsets = [0, 128], sizes = [8, 128], strides = [1, 1]} : vector<8x384xf32> to vector<8x128xf32>
      %31 = vector.extract_strided_slice %21 {offsets = [0, 128], sizes = [8, 128], strides = [1, 1]} : vector<8x384xf32> to vector<8x128xf32>
      %32 = arith.addf %30, %31 : vector<8x128xf32>
      %33 = arith.negf %32 : vector<8x128xf32>
      %34 = math.exp %33 : vector<8x128xf32>
      %cst_21 = arith.constant 1.000000e+00 : f32
      %35 = vector.broadcast %cst_21 : f32 to vector<8x128xf32>
      %36 = arith.addf %35, %34 : vector<8x128xf32>
      %37 = arith.divf %35, %36 : vector<8x128xf32>
      %38 = vector.extract_strided_slice %17 {offsets = [0, 256], sizes = [8, 128], strides = [1, 1]} : vector<8x384xf32> to vector<8x128xf32>
      %39 = vector.extract_strided_slice %21 {offsets = [0, 256], sizes = [8, 128], strides = [1, 1]} : vector<8x384xf32> to vector<8x128xf32>
      %40 = arith.mulf %29, %39 : vector<8x128xf32>
      %41 = arith.addf %38, %40 : vector<8x128xf32>
      %42 = math.tanh %41 : vector<8x128xf32>
      %cst_22 = arith.constant 1.000000e+00 : f32
      %43 = vector.broadcast %cst_22 : f32 to vector<8x128xf32>
      %44 = arith.subf %43, %37 : vector<8x128xf32>
      %45 = arith.mulf %44, %42 : vector<8x128xf32>
      %46 = arith.mulf %37, %arg9 : vector<8x128xf32>
      %47 = arith.addf %45, %46 : vector<8x128xf32>
      %48 = arith.sitofp %arg8 : i32 to f32
      %49 = vector.broadcast %48 : f32 to vector<8x1xf32>
      %50 = arith.cmpf olt, %49, %9 : vector<8x1xf32>
      %51 = vector.shape_cast %50 : vector<8x1xi1> to vector<8x1xi1>
      %52 = vector.broadcast %51 : vector<8x1xi1> to vector<8x128xi1>
      %53 = arith.select %52, %47, %arg9 : vector<8x128xi1>, vector<8x128xf32>
      scf.yield %53 : vector<8x128xf32>
    }
    %c8_i32_14 = arith.constant 8 : i32
    %c0_15 = arith.constant 0 : index
    %c0_16 = arith.constant 0 : index
    %13 = vector.load %arg6[%c0_15, %c0_16] : memref<8x128xf32, #tpu.memory_space<vmem>>, vector<8x128xf32>
    tpu.vector_store %arg6[%c0_15, %c0_16], %12 {strides = array<i32>} : memref<8x128xf32, #tpu.memory_space<vmem>>, vector<8x128xf32>,
    return
  }
}

</mosaic_0001>

<bundles_post_ra>
// kernel: tpu_custom_call.1
= control target key start
LH: loop header
LB: loop body
LE: loop exit
PB: predicated region body
PF: predicated region fallthrough
CT: control target
= control target key end

     0   :  { %11 = vsyncpa [#allocation4], 0  ;;  %s1319_s0 = inlined_call_operand.hbm [shape: bf16[64,128], index: 0, kind: input, shape index: {}]   ;;  %s1320_s1 = inlined_call_operand.vmem [shape: f32[8,1], index: 1, kind: input, shape index: {}]   ;;  %s1321_s2 = inlined_call_operand.hbm [shape: bf16[128,384], index: 2, kind: input, shape index: {}]   ;;  %s1322_s3 = inlined_call_operand.hbm [shape: bf16[128,384], index: 3, kind: input, shape index: {}]   ;;  %s1323_s4 = inlined_call_operand.vmem [shape: f32[1,384], index: 4, kind: input, shape index: {}]   ;;  %s1324_s5 = inlined_call_operand.vmem [shape: f32[1,384], index: 5, kind: input, shape index: {}]   ;;  %s1325_s6 = inlined_call_operand.hbm [shape: f32[8,128], index: 6, kind: output, shape index: {}]  }
   0x1   :  { %12 = vsyncpa [#allocation7], 0 }
   0x2   :  { %13 = vsyncpa [#allocation5], 0  ;;  %s1069_s21 = smov [#allocation6]  }
   0x3   :  { %s33_s22 = sshll.u32 %s1069_s21, 4  ;;  %s34_s22 = int_to_ptr.vmem [resolvable:$true] %s33_s22 }
   0x4   :  { %s975_s23 = scalar_lea.vmem %s34_s22, 3072  ;;  %p980_p1 = scmp.lt.s32.totalorder %s34_s22, %s34_s22 }
   0x5   :  { %p976_p0 = scmp.ne.s32.totalorder %s34_s22, %s975_s23  ;;  %p981_p2 = scmp.lt.s32.totalorder %s975_s23, %s975_s23 }
   0x7   :  { %p982_p3 = por %p981_p2, %p980_p1 }
   0x9   :  { %p983_p4 = pnand %p982_p3, %p976_p0 }
   0xb   :  { %986 = shalt.err (!%p983_p4)
}
   0xc   :  { %s1070_s24 = smov 192   ;;  %s1071_s25 = smov 12  }
   0xd   :  { %39 = dma.hbm_to_vmem [thread:$0]  %s1321_s2, 3072, %s34_s22, [#allocation7], %s1070_s24, %s1070_s24, %s1071_s25  }
   0xe   :  { %s1072_s28 = smov [#allocation3]  }
   0xf   :  { %s19_s29 = sshll.u32 %s1072_s28, 4  ;;  %s20_s29 = int_to_ptr.vmem [resolvable:$true] %s19_s29 }
  0x10   :  { %s995_s30 = scalar_lea.vmem %s20_s29, 512  ;;  %p1000_p6 = scmp.lt.s32.totalorder %s20_s29, %s20_s29 }
  0x11   :  { %p996_p5 = scmp.ne.s32.totalorder %s20_s29, %s995_s30  ;;  %p1001_p7 = scmp.lt.s32.totalorder %s995_s30, %s995_s30 }
  0x13   :  { %p1002_p8 = por %p1001_p7, %p1000_p6 }
  0x15   :  { %p1003_p9 = pnand %p1002_p8, %p996_p5 }
  0x17   :  { %1006 = shalt.err (!%p1003_p9)
}
  0x18   :  { %s1073_s7 = smov 64   ;;  %s1074_s8 = smov 4  }
  0x19   :  { %25 = dma.hbm_to_vmem [thread:$0]  %s1319_s0, 512, %s20_s29, [#allocation4], %s1073_s7, %s1073_s7, %s1074_s8  }
  0x1a   :  { %s1075_s11 = smov [#allocation8]  }
  0x1b   :  { %s45_s12 = sshll.u32 %s1075_s11, 4  ;;  %s46_s12 = int_to_ptr.vmem [resolvable:$true] %s45_s12 }
  0x1c   :  { %s1015_s2 = scalar_lea.vmem %s46_s12, 3072  ;;  %p1020_p11 = scmp.lt.s32.totalorder %s46_s12, %s46_s12 }
  0x1d   :  { %p1016_p10 = scmp.ne.s32.totalorder %s46_s12, %s1015_s2  ;;  %p1021_p12 = scmp.lt.s32.totalorder %s1015_s2, %s1015_s2 }
  0x1f   :  { %p1022_p13 = por %p1021_p12, %p1020_p11 }
  0x21   :  { %p1023_p0 = pnand %p1022_p13, %p1016_p10 }
  0x23   :  { %1026 = shalt.err (!%p1023_p0)
}
  0x24   :  { %51 = dma.hbm_to_vmem [thread:$0]  %s1322_s3, 3072, %s46_s12, [#allocation7], %s1070_s24, %s1070_s24, %s1071_s25  }
  0x25   :  { %1055 = dma.done.wait [#allocation4], 512  }
  0x26   :  { %1056 = vsyncadd [#allocation4], 4294966784 }
  0x27   :  { %1057 = dma.done.wait [#allocation7], 6144  }
  0x28   :  { %1058 = vsyncadd [#allocation7], 4294961152  ;;  %v1076_v0 = vmov 0   ;;  %v1126_v1 = vld [vmem:[#allocation8] sm:$0xff]  ;;  %v1128_v2 = vld [vmem:[#allocation8 + $0x8] sm:$0xf]  ;;  %v108_v63 = vlaneseq }
  0x29   :  { %307 = vmatprep.mubr.bf16.mxu0 %v1076_v0  ;;  %v1130_v3 = vld [vmem:[#allocation8 + $0xc] sm:$0xff]  ;;  %v1132_v4 = vld [vmem:[#allocation8 + $0x14] sm:$0xf]  ;;  %v1134_v5 = vld [vmem:[#allocation8 + $0x18] sm:$0xff] }
  0x2a   :  { %v1136_v6 = vld [vmem:[#allocation8 + $0x20] sm:$0xf]  ;;  %v1138_v7 = vld [vmem:[#allocation8 + $0x24] sm:$0xff]  ;;  %v1140_v8 = vld [vmem:[#allocation8 + $0x2c] sm:$0xf] }
  0x2b   :  { %v1142_v9 = vld [vmem:[#allocation8 + $0x30] sm:$0xff]  ;;  %v1144_v10 = vld [vmem:[#allocation8 + $0x38] sm:$0xf]  ;;  %v1146_v11 = vld [vmem:[#allocation8 + $0x3c] sm:$0xff] }
  0x2c   :  { %v1148_v12 = vld [vmem:[#allocation8 + $0x44] sm:$0xf]  ;;  %v1150_v13 = vld [vmem:[#allocation8 + $0x48] sm:$0xff]  ;;  %v1152_v14 = vld [vmem:[#allocation8 + $0x50] sm:$0xf] }
  0x2d   :  { %v1154_v15 = vld [vmem:[#allocation8 + $0x54] sm:$0xff]  ;;  %v1156_v16 = vld [vmem:[#allocation8 + $0x5c] sm:$0xf]  ;;  %v1158_v17 = vld [vmem:[#allocation8 + $0x60] sm:$0xff] }
  0x2e   :  { %v1160_v18 = vld [vmem:[#allocation8 + $0x68] sm:$0xf]  ;;  %v1162_v19 = vld [vmem:[#allocation8 + $0x6c] sm:$0xff]  ;;  %v1164_v20 = vld [vmem:[#allocation8 + $0x74] sm:$0xf] }
  0x2f   :  { %v1166_v21 = vld [vmem:[#allocation8 + $0x78] sm:$0xff]  ;;  %v1168_v22 = vld [vmem:[#allocation8 + $0x80] sm:$0xf]  ;;  %v1170_v23 = vld [vmem:[#allocation8 + $0x84] sm:$0xff] }
  0x30   :  { %v1172_v24 = vld [vmem:[#allocation8 + $0x8c] sm:$0xf]  ;;  %v1174_v25 = vld [vmem:[#allocation8 + $0x90] sm:$0xff]  ;;  %v1176_v26 = vld [vmem:[#allocation8 + $0x98] sm:$0xf] }
  0x31   :  { %v1178_v27 = vld [vmem:[#allocation8 + $0x9c] sm:$0xff]  ;;  %v1180_v28 = vld [vmem:[#allocation8 + $0xa4] sm:$0xf]  ;;  %v1182_v29 = vld [vmem:[#allocation8 + $0xa8] sm:$0xff] }
  0x32   :  { %v1184_v30 = vld [vmem:[#allocation8 + $0xb0] sm:$0xf]  ;;  %v1186_v31 = vld [vmem:[#allocation8 + $0xb4] sm:$0xff]  ;;  %v1188_v32 = vld [vmem:[#allocation8 + $0xbc] sm:$0xf] }
  0x33   :  { %v1193_v33 = vld [vmem:[%s1324_s5] sm:$0x7]  ;;  %v920_v35 = vld [vmem:[#allocation6 + $0xac] ss:$12 sps:$4 sm:$0xff]   ;;  %v922_v36 = vld [vmem:[#allocation6 + $0xa8] ss:$12 sps:$4 sm:$0xff]  }
  0x34   :  { %v1198_v34 = vld [vmem:[%s1320_s1] sm:$0xff]  ;;  %275 = vmatprep.subr.bf16.mxu0 %v920_v35  ;;  %v925_v38 = vld [vmem:[#allocation6 + $0x90] ss:$12 sps:$4 sm:$0xff]   ;;  %v934_v46 = vld [vmem:[#allocation6 + $0x4c] ss:$12 sps:$4 sm:$0xff]   ;;  %v1203_v35 = vshrl.u32 %v108_v63, 7 }
  0x35   :  { %v923_v37 = vld [vmem:[#allocation6 + $0x94] ss:$12 sps:$4 sm:$0xff]   ;;  %276 = vmatpush1.bf16.msra.mxu0 %v922_v36  ;;  %v926_v39 = vld [vmem:[#allocation6 + $0x7c] ss:$12 sps:$4 sm:$0xff]   ;;  %v933_v41 = vld [vmem:[#allocation6 + $0x98] ss:$12 sps:$4 sm:$0xff]  }
  0x36   :  { %277 = vmatprep.subr.bf16.mxu0 %v923_v37  ;;  %v929_v40 = vld [vmem:[#allocation6 + $0xb0] ss:$12 sps:$4 sm:$0xff]   ;;  %v928_v42 = vld [vmem:[#allocation6 + $0x78] ss:$12 sps:$4 sm:$0xff]   ;;  %v937_v44 = vld [vmem:[#allocation6 + $0x80] ss:$12 sps:$4 sm:$0xff]  }
  0x37   :  { %848 = vmatprep.subr.bf16.mxu1 %v929_v40  ;;  %v930_v43 = vld [vmem:[#allocation6 + $0x64] ss:$12 sps:$4 sm:$0xff]   ;;  %v932_v45 = vld [vmem:[#allocation6 + $0x60] ss:$12 sps:$4 sm:$0xff]   ;;  %v941_v47 = vld [vmem:[#allocation6 + $0x68] ss:$12 sps:$4 sm:$0xff]  }
  0x38   :  { %849 = vmatpush3.bf16.msra.mxu1 %v929_v40  ;;  %v936_v48 = vld [vmem:[#allocation6 + $0x48] ss:$12 sps:$4 sm:$0xff]   ;;  %v945_v50 = vld [vmem:[#allocation6 + $0x50] ss:$12 sps:$4 sm:$0xff]   ;;  %v950_v51 = vld [vmem:[#allocation3] sm:$0xff]   ;;  %v110_v36 = vsub.s32 0, %v1203_v35 }
  0x39   :  { %278 = vmatpush1.bf16.msra.mxu0 %v925_v38  ;;  %850 = vmatprep.subr.bf16.mxu1 %v933_v41  ;;  %v938_v49 = vld [vmem:[#allocation6 + $0x34] ss:$12 sps:$4 sm:$0xff]   ;;  %v940_v52 = vld [vmem:[#allocation6 + $0x30] ss:$12 sps:$4 sm:$0xff]   ;;  %v949_v54 = vld [vmem:[#allocation6 + $0x38] ss:$12 sps:$4 sm:$0xff]  }
  0x3a   :  { %279 = vmatprep.subr.bf16.mxu0 %v926_v39  ;;  %864 = vmatprep.mubr.bf16.mxu1 %v950_v51  ;;  %v942_v53 = vld [vmem:[#allocation6 + $0x1c] ss:$12 sps:$4 sm:$0xff]   ;;  %v944_v55 = vld [vmem:[#allocation6 + $0x18] ss:$12 sps:$4 sm:$0xff]   ;;  %v951_v57 = vld [vmem:[#allocation6 + $0x20] ss:$12 sps:$4 sm:$0xff]  }
  0x3b   :  { %v946_v56 = vld [vmem:[#allocation6 + $0x4] ss:$12 sps:$4 sm:$0xff]   ;;  %v948_v58 = vld [vmem:[#allocation6] ss:$12 sps:$4 sm:$0xff]   ;;  %v952_v59 = vld [vmem:[#allocation6 + $0x8] ss:$12 sps:$4 sm:$0xff]  }
  0x3c   :  { %851 = vmatpush3.bf16.msra.mxu1 %v933_v41  ;;  %v954_v60 = vld [vmem:[#allocation3 + $0x10] sm:$0xff]   ;;  %v953_v61 = vld [vmem:[#allocation3 + $0x8] sm:$0xff]   ;;  %v955_v62 = vld [vmem:[#allocation3 + $0x18] sm:$0xff]   ;;  %v114_v38 = vsub.s32 1, %v1203_v35  ;;  %v118_v40 = vsub.s32 2, %v1203_v35 }
  0x3d   :  { %280 = vmatpush1.bf16.msra.mxu0 %v928_v42  ;;  %852 = vmatprep.subr.bf16.mxu1 %v937_v44  ;;  %v106_v37 = vld [vmem:[%s1323_s4] sm:$0x7]  ;;  %s1239_s4 = smov 0  }
  0x3e   :  { %281 = vmatprep.subr.bf16.mxu0 %v930_v43  ;;  %v1212_v39 = vrot.slane %v106_v37, %v110_v36  ;;  %v119_v43 = vrot.slane %v106_v37, %v118_v40 }
  0x40   :  { %853 = vmatpush3.bf16.msra.mxu1 %v937_v44 }
  0x41   :  { %282 = vmatpush1.bf16.msra.mxu0 %v932_v45  ;;  %854 = vmatprep.subr.bf16.mxu1 %v941_v47 }
  0x42   :  { %283 = vmatprep.subr.bf16.mxu0 %v934_v46 }
  0x44   :  { %855 = vmatpush3.bf16.msra.mxu1 %v941_v47 }
  0x45   :  { %284 = vmatpush1.bf16.msra.mxu0 %v936_v48  ;;  %856 = vmatprep.subr.bf16.mxu1 %v945_v50 }
  0x46   :  { %285 = vmatprep.subr.bf16.mxu0 %v938_v49 }
  0x48   :  { %857 = vmatpush3.bf16.msra.mxu1 %v945_v50 }
  0x49   :  { %286 = vmatpush1.bf16.msra.mxu0 %v940_v52  ;;  %858 = vmatprep.subr.bf16.mxu1 %v949_v54 }
  0x4a   :  { %287 = vmatprep.subr.bf16.mxu0 %v942_v53 }
  0x4c   :  { %859 = vmatpush3.bf16.msra.mxu1 %v949_v54 }
  0x4d   :  { %288 = vmatpush1.bf16.msra.mxu0 %v944_v55  ;;  %860 = vmatprep.subr.bf16.mxu1 %v951_v57 }
  0x4e   :  { %289 = vmatprep.subr.bf16.mxu0 %v946_v56 }
  0x50   :  { %861 = vmatpush3.bf16.msra.mxu1 %v951_v57 }
  0x51   :  { %290 = vmatpush1.bf16.msra.mxu0 %v948_v58  ;;  %862 = vmatprep.subr.bf16.mxu1 %v952_v59 }
  0x54   :  { %308 = vmatmul.mubr.bf16.vlgmr.msra.gmra.mxu0 %v950_v51  ;;  %863 = vmatpush3.bf16.msra.mxu1 %v952_v59 }
  0x55   :  { %317 = vmatprep.mubr.bf16.mxu0 %v1076_v0 }
  0x57   :  { %865 = vmatmul.mubr.bf16.vlgmr.msra.gmra.mxu1 %v953_v61 }
  0x58   :  { %868 = vmatprep.mubr.bf16.mxu1 %v954_v60 }
  0x5c   :  { %318 = vmatmul.mubr.bf16.gmra.mxu0 %v953_v61 }
  0x5d   :  { %327 = vmatprep.mubr.bf16.mxu0 %v1076_v0 }
  0x5f   :  { %869 = vmatmul.mubr.bf16.gmra.mxu1 %v955_v62 }
  0x64   :  { %328 = vmatmul.mubr.bf16.gmra.mxu0 %v954_v60 }
  0x65   :  { %337 = vmatprep.mubr.bf16.mxu0 %v1076_v0  ;;  %v1217_v0 = vrot.slane %v106_v37, %v114_v38 }
  0x6c   :  { %338 = vmatmul.mubr.bf16.gmra.mxu0 %v955_v62 }
 0x114   :  { %v309_v41 = vpop.f32.mrf.mxu0 }
 0x115   :  { %v310_v42 = vadd.f32 %v309_v41, %v1212_v39 }
 0x116   :  { %v311_v44 = vpop.f32.mrf.mxu0 }
 0x117   :  { %413 = vst [vmem:[#allocation2] sm:$0xff] %v310_v42  ;;  %v312_v45 = vadd.f32 %v311_v44, %v1217_v0  ;;  %v866_v47 = vpop.f32.mrf.mxu1 }
 0x118   :  { %v313_v46 = vpop.f32.mrf.mxu0  ;;  %v391_v49 = vadd.f32 %v866_v47, %v119_v43 }
 0x119   :  { %414 = vst [vmem:[#allocation2 + $0x8] sm:$0xff] %v312_v45  ;;  %v314_v48 = vadd.f32 %v313_v46, %v1212_v39  ;;  %v382_v51 = vpop.f32.mrf.mxu1 }
 0x11a   :  { %v315_v50 = vpop.f32.mrf.mxu0  ;;  %421 = vst [vmem:[#allocation2 + $0x40] sm:$0xff] %v391_v49  ;;  %v383_v53 = vadd.f32 %v382_v51, %v119_v43 }
 0x11b   :  { %416 = vst [vmem:[#allocation2 + $0x18] sm:$0xff] %v314_v48  ;;  %v316_v52 = vadd.f32 %v315_v50, %v1217_v0  ;;  %v867_v55 = vpop.f32.mrf.mxu1 }
 0x11c   :  { %v319_v54 = vpop.f32.mrf.mxu0  ;;  %415 = vst [vmem:[#allocation2 + $0x10] sm:$0xff] %v383_v53  ;;  %v394_v57 = vadd.f32 %v867_v55, %v119_v43 }
 0x11d   :  { %417 = vst [vmem:[#allocation2 + $0x20] sm:$0xff] %v316_v52  ;;  %v320_v56 = vadd.f32 %v319_v54, %v1212_v39  ;;  %v385_v59 = vpop.f32.mrf.mxu1 }
 0x11e   :  { %v321_v58 = vpop.f32.mrf.mxu0  ;;  %424 = vst [vmem:[#allocation2 + $0x58] sm:$0xff] %v394_v57  ;;  %v386_v61 = vadd.f32 %v385_v59, %v119_v43 }
 0x11f   :  { %419 = vst [vmem:[#allocation2 + $0x30] sm:$0xff] %v320_v56  ;;  %v322_v60 = vadd.f32 %v321_v58, %v1217_v0  ;;  %v870_v63 = vpop.f32.mrf.mxu1 }
 0x120   :  { %v323_v62 = vpop.f32.mrf.mxu0  ;;  %418 = vst [vmem:[#allocation2 + $0x28] sm:$0xff] %v386_v61  ;;  %v407_v41 = vadd.f32 %v870_v63, %v119_v43 }
 0x121   :  { %420 = vst [vmem:[#allocation2 + $0x38] sm:$0xff] %v322_v60  ;;  %v324_v37 = vadd.f32 %v323_v62, %v1212_v39  ;;  %v398_v44 = vpop.f32.mrf.mxu1 }
 0x122   :  { %v325_v42 = vpop.f32.mrf.mxu0  ;;  %433 = vst [vmem:[#allocation2 + $0xa0] sm:$0xff] %v407_v41  ;;  %v399_v46 = vadd.f32 %v398_v44, %v119_v43 }
 0x123   :  { %422 = vst [vmem:[#allocation2 + $0x48] sm:$0xff] %v324_v37  ;;  %v326_v45 = vadd.f32 %v325_v42, %v1217_v0  ;;  %v871_v48 = vpop.f32.mrf.mxu1  ;;  %v1237_v42 = vmov 0.0  }
 0x124   :  { %v329_v47 = vpop.f32.mrf.mxu0  ;;  %427 = vst [vmem:[#allocation2 + $0x70] sm:$0xff] %v399_v46  ;;  %v410_v50 = vadd.f32 %v871_v48, %v119_v43 }
 0x125   :  { %423 = vst [vmem:[#allocation2 + $0x50] sm:$0xff] %v326_v45  ;;  %v330_v49 = vadd.f32 %v329_v47, %v1212_v39  ;;  %v401_v52 = vpop.f32.mrf.mxu1 }
 0x126   :  { %v331_v51 = vpop.f32.mrf.mxu0  ;;  %436 = vst [vmem:[#allocation2 + $0xb8] sm:$0xff] %v410_v50  ;;  %v402_v54 = vadd.f32 %v401_v52, %v119_v43 }
 0x127   :  { %425 = vst [vmem:[#allocation2 + $0x60] sm:$0xff] %v330_v49  ;;  %v332_v53 = vadd.f32 %v331_v51, %v1217_v0 }
 0x128   :  { %v333_v55 = vpop.f32.mrf.mxu0  ;;  %430 = vst [vmem:[#allocation2 + $0x88] sm:$0xff] %v402_v54 }
 0x129   :  { %426 = vst [vmem:[#allocation2 + $0x68] sm:$0xff] %v332_v53  ;;  %v334_v56 = vadd.f32 %v333_v55, %v1212_v39 }
 0x12a   :  { %v335_v57 = vpop.f32.mrf.mxu0 }
 0x12b   :  { %428 = vst [vmem:[#allocation2 + $0x78] sm:$0xff] %v334_v56  ;;  %v336_v58 = vadd.f32 %v335_v57, %v1217_v0 }
 0x12c   :  { %v339_v59 = vpop.f32.mrf.mxu0 }
 0x12d   :  { %429 = vst [vmem:[#allocation2 + $0x80] sm:$0xff] %v336_v58  ;;  %v340_v60 = vadd.f32 %v339_v59, %v1212_v39 }
 0x12e   :  { %v341_v61 = vpop.f32.mrf.mxu0 }
 0x12f   :  { %431 = vst [vmem:[#allocation2 + $0x90] sm:$0xff] %v340_v60  ;;  %v342_v62 = vadd.f32 %v341_v61, %v1217_v0 }
 0x130   :  { %v343_v63 = vpop.f32.mrf.mxu0 }
 0x131   :  { %432 = vst [vmem:[#allocation2 + $0x98] sm:$0xff] %v342_v62  ;;  %v344_v43 = vadd.f32 %v343_v63, %v1212_v39 }
 0x132   :  { %v345_v37 = vpop.f32.mrf.mxu0 }
 0x133   :  { %434 = vst [vmem:[#allocation2 + $0xa8] sm:$0xff] %v344_v43  ;;  %v346_v41 = vadd.f32 %v345_v37, %v1217_v0 }
 0x135   :  { %435 = vst [vmem:[#allocation2 + $0xb0] sm:$0xff] %v346_v41 }
 0x136 LB: > { %v822_v39 = vcombine.high %v1182_v29, %v1186_v31  ;;  %v821_v0 = vcombine.low %v1182_v29, %v1186_v31  ;;  %v819_v44 = vcombine.high %v1174_v25, %v1178_v27  ;;  %v818_v45 = vcombine.low %v1174_v25, %v1178_v27  ;;  %s734_s17 = scvt.s32.f32 %s1067_s4  ;;  %s798_s18 = sshll.u32 %s1067_s4, 3  ;;  %s1067_s4 = sphi %s1239_s4, %s476_s4   ;;  %v1063_v42 = vphi %v1237_v42, %v1326_v42  }
 0x137   : > { %v816_v46 = vcombine.high %v1166_v21, %v1170_v23  ;;  %v1077_v47 = vmov 0.0   ;;  %v823_v48 = vcombine.low %v1184_v30, %v1188_v32  ;;  %v1078_v49 = vmov 0   ;;  %s479_s19 = sshra.s32 %s798_s18, 3  ;;  %s476_s4 = sadd.s32 1, %s1067_s4  }
 0x138   : > { %632 = vmatprep.subr.bf16.mxu0 %v822_v39  ;;  %872 = vmatprep.subr.bf16.mxu1 %v1077_v47  ;;  %v820_v50 = vcombine.low %v1176_v26, %v1180_v28  ;;  %v815_v51 = vcombine.low %v1166_v21, %v1170_v23  ;;  %v735_v52 = vstv %s734_s17  ;;  %v813_v53 = vcombine.high %v1158_v17, %v1162_v19  ;;  %s826_s20 = smul.u32 24, %s479_s19  ;;  %p473_p1 = scmp.ge.s32.totalorder %s476_s4, 8  }
 0x139   : > { %633 = vmatpush1.bf16.msra.mxu0 %v821_v0  ;;  %664 = vmatprep.mubr.bf16.mxu0 %v1078_v49  ;;  %vm1079_vm0 = vmmov 0   ;;  %vm736_vm1 = vcmp.lt.f32.partialorder %v735_v52, %v1198_v34  ;;  %v817_v55 = vcombine.low %v1168_v22, %v1172_v24  ;;  %v812_v56 = vcombine.low %v1158_v17, %v1162_v19  ;;  %s1080_s22 = smov (%p473_p1), [#allocation9]  }
 0x13a   : > { %634 = vmatprep.subr.bf16.mxu0 %v819_v44  ;;  %956 = vset.pattern.permute.xlu0 %v1078_v49  ;;  %v737_v54 = vsel %vm736_vm1, 1, %v1078_v49  ;;  %v810_v57 = vcombine.high %v1150_v13, %v1154_v15  ;;  %v814_v58 = vcombine.low %v1160_v18, %v1164_v20  ;;  %v809_v59 = vcombine.low %v1150_v13, %v1154_v15  ;;  %s483_s21 = scalar_lea.vmem [#allocation2], %s826_s20  ;;  %s750_s23 = sshll.u32 (%p473_p1), %s1080_s22, 4  ;;  %s751_s23 = int_to_ptr.vmem [resolvable:$true] %s750_s23 }
 0x13b   : > { %873 = vmatpush3.bf16.msra.mxu1 %v823_v48  ;;  %888 = vmatprep.mubr.msk.bf16.mxu1 %vm1079_vm0, %v1077_v47  ;;  %v807_v60 = vcombine.high %v1142_v9, %v1146_v11  ;;  %v811_v61 = vcombine.low %v1152_v14, %v1156_v16  ;;  %v806_v62 = vcombine.low %v1142_v9, %v1146_v11  ;;  %s1027_s24 = scalar_lea.vmem (%p473_p1), %s751_s23, 128  ;;  %p1032_p3 = scmp.lt.s32.totalorder (%p473_p1), %s751_s23, %s751_s23 }
 0x13c   : > { %874 = vmatprep.subr.bf16.mxu1 %v1077_v47  ;;  %739 = vperm.xlu0 %956, %v737_v54   ;;  %v804_v63 = vcombine.high %v1134_v5, %v1138_v7  ;;  %v808_v43 = vcombine.low %v1144_v10, %v1148_v12  ;;  %v803_v37 = vcombine.low %v1134_v5, %v1138_v7  ;;  %v484_v48 = vld [vmem:[%s483_s21] sm:$0xff]  ;;  %p1028_p2 = scmp.ne.s32.totalorder (%p473_p1), %s751_s23, %s1027_s24  ;;  %p1033_p4 = scmp.lt.s32.totalorder (%p473_p1), %s1027_s24, %s1027_s24 }
 0x13d   : > { %635 = vmatpush1.bf16.msra.mxu0 %v818_v45  ;;  %v801_v41 = vcombine.high %v1126_v1, %v1130_v3  ;;  %v805_v39 = vcombine.low %v1136_v6, %v1140_v8  ;;  %v800_v0 = vcombine.low %v1126_v1, %v1130_v3  ;;  %v487_v44 = vpack.c.bf16 %v1063_v42, %v1063_v42 }
 0x13e   : > { %636 = vmatprep.subr.bf16.mxu0 %v816_v46  ;;  %v802_v45 = vcombine.low %v1128_v2, %v1132_v4  ;;  %v492_v46 = vrot.slane %v1193_v33, %v110_v36  ;;  %p1034_p5 = por (%p473_p1), %p1033_p4, %p1032_p3 }
 0x13f   : > { %875 = vmatpush3.bf16.msra.mxu1 %v820_v50 }
 0x140   : > { %876 = vmatprep.subr.bf16.mxu1 %v1077_v47  ;;  %p1035_p6 = pnand (%p473_p1), %p1034_p5, %p1028_p2 }
 0x141   : > { %637 = vmatpush1.bf16.msra.mxu0 %v815_v51  ;;  %v496_v51 = vrot.slane %v1193_v33, %v114_v38 }
 0x142   : > { %638 = vmatprep.subr.bf16.mxu0 %v813_v53 }
 0x143   : > { %877 = vmatpush3.bf16.msra.mxu1 %v817_v55 }
 0x144   : > { %878 = vmatprep.subr.bf16.mxu1 %v1077_v47 }
 0x145   : > { %639 = vmatpush1.bf16.msra.mxu0 %v812_v56 }
 0x146   : > { %640 = vmatprep.subr.bf16.mxu0 %v810_v57 }
 0x147   : > { %879 = vmatpush3.bf16.msra.mxu1 %v814_v58  ;;  %v485_v58 = vld [vmem:[%s483_s21 + $0x8] sm:$0xff] }
 0x148   : > { %880 = vmatprep.subr.bf16.mxu1 %v1077_v47 }
 0x149   : > { %641 = vmatpush1.bf16.msra.mxu0 %v809_v59 }
 0x14a   : > { %642 = vmatprep.subr.bf16.mxu0 %v807_v60 }
 0x14b   : > { %881 = vmatpush3.bf16.msra.mxu1 %v811_v61 }
 0x14c   : > { %882 = vmatprep.subr.bf16.mxu1 %v1077_v47 }
 0x14d   : > { %643 = vmatpush1.bf16.msra.mxu0 %v806_v62 }
 0x14e   : > { %644 = vmatprep.subr.bf16.mxu0 %v804_v63 }
 0x14f   : > { %883 = vmatpush3.bf16.msra.mxu1 %v808_v43 }
 0x150   : > { %884 = vmatprep.subr.bf16.mxu1 %v1077_v47 }
 0x151   : > { %645 = vmatpush1.bf16.msra.mxu0 %v803_v37 }
 0x152   : > { %646 = vmatprep.subr.bf16.mxu0 %v801_v41  ;;  %v500_v41 = vrot.slane %v1193_v33, %v118_v40 }
 0x153   : > { %885 = vmatpush3.bf16.msra.mxu1 %v805_v39 }
 0x154   : > { %886 = vmatprep.subr.bf16.mxu1 %v1077_v47 }
 0x155   : > { %647 = vmatpush1.bf16.msra.mxu0 %v800_v0 }
 0x157   : > { %887 = vmatpush3.bf16.msra.mxu1 %v802_v45 }
 0x158   : > { %665 = vmatmul.mubr.bf16.vlgmr.msra.gmra.mxu0 %v487_v44 }
 0x15a   : > { %889 = vmatmul.mubr.bf16.vlgmr.msra.gmra.mxu1 %v487_v44 }
 0x218   : > { %v666_v49 = vpop.f32.mrf.mxu0 }
 0x219   : > { %v667_v50 = vadd.f32 %v666_v49, %v492_v46  ;;  %v486_v46 = vld [vmem:[%s483_s21 + $0x10] sm:$0xff] }
 0x21a   : > { %v668_v52 = vpop.f32.mrf.mxu0  ;;  %v707_v53 = vpop.f32.mrf.mxu1 }
 0x21b   : > { %v713_v47 = vadd.f32 %v667_v50, %v484_v48  ;;  %v669_v56 = vadd.f32 %v668_v52, %v496_v51  ;;  %v708_v44 = vadd.f32 %v707_v53, %v500_v41  ;;  %v740_v51 = vpop.permute.xlu0 %739 }
 0x21c   : > { %v670_v54 = vpop.f32.mrf.mxu0  ;;  %v890_v57 = vpop.f32.mrf.mxu1  ;;  %vm741_vm2 = vcmp.eq.s32.totalorder %v740_v51, 1 }
 0x21d   : > { %v824_v55 = vmul.f32 -1.442695, %v713_v47  ;;  %v720_v61 = vadd.f32 %v669_v56, %v485_v58 }
 0x21e   : > { %v671_v59 = vpop.f32.mrf.mxu0  ;;  %v710_v60 = vpop.f32.mrf.mxu1 }
 0x21f   : > { %957 = vpow2.f32 %v824_v55  ;;  %v825_v63 = vmul.f32 -1.442695, %v720_v61 }
 0x220   : > { %v891_v62 = vpop.f32.mrf.mxu1 }
 0x221   : > { %959 = vpow2.f32 %v825_v63 }
 0x22c   : > { %v958_v43 = vpop.eup %957 }
 0x22d   : > { %v717_v37 = vadd.f32 1.0, %v958_v43 }
 0x22e   : > { %v960_v39 = vpop.eup %959 }
 0x22f   : > { %961 = vrcp.f32 %v717_v37  ;;  %v724_v0 = vadd.f32 1.0, %v960_v39 }
 0x231   : > { %963 = vrcp.f32 %v724_v0 }
 0x23c   : > { %v962_v45 = vpop.eup %961 }
 0x23d   : > { %v727_v48 = vmul.f32 %v962_v45, %v708_v44 }
 0x23e   : > { %v964_v50 = vpop.eup %963 }
 0x23f   : > { %v728_v49 = vadd.f32 %v727_v48, %v486_v46  ;;  %v730_v52 = vsub.f32 1.0, %v964_v50  ;;  %v732_v55 = vmul.f32 %v1063_v42, %v964_v50 }
 0x241   : > { %965 = vtanh.f32 %v728_v49 }
 0x24e   : > { %v966_v47 = vpop.eup %965 }
 0x24f   : > { %v731_v54 = vmul.f32 %v966_v47, %v730_v52 }
 0x250   :  { %475 = sbr.rel (!%p473_p1) target bundleno = 310 (0x136), region = 64 }
 0x251   : > { %v733_v56 = vadd.f32 %v732_v55, %v731_v54 }
 0x253   : > { %v742_v57 = vsel %vm741_vm2, %v733_v56, %v1063_v42  }
 0x254   : > { %v1326_v42 = vmov %v742_v57  ;;  %743 = vst [vmem:[#allocation9] sm:$0xff] (%p473_p1), %v742_v57 }
 0x255   :  { %1038 = shalt.err (!%p1035_p6)
}
 0x256   :  { %753 = dma.vmem_to_hbm [thread:$0]  %s751_s23, 128, %s1325_s6, [#allocation5]  }
 0x257   :  { %1059 = dma.done.wait [#allocation5], 128  }
 0x258   :  { %1060 = vsyncadd [#allocation5], 4294967168 }
 0x259   :  { %757 = vsyncpa [#allocation4], 1 }
 0x25a   :  { %758 = vsyncpa [#allocation7], 1 }
 0x25b   :  { %759 = vsyncpa [#allocation5], 1 }

</bundles_post_ra>
